<compile_context>
chip_gen: v6e
topology: v6e:2x2x1
jax: 0.10.0
libtpu: 0.0.40
codegen_flags: <defaults>
</compile_context>

<pallas_src>
import functools
import math

import jax
import jax.numpy as jnp
from jax.experimental import pallas as pl
from jax.experimental.pallas import tpu as pltpu


def _round_up(x, m):
    return pl.cdiv(x, m) * m


# ----------------------------------------------------------------------------
# Kernel
# ----------------------------------------------------------------------------
def rnd_kernel(x_ref, w0_ref, b0_ref, w1_ref, b1_ref, wd_ref, bd_ref, out_ref):
    """Fused f / f_hat forward + folded difference, one batch tile.

    x_ref : (block_m, ob_dim)   observations, batch-major (contiguous DMA)
    w0    : (2S, ob_dim)        [f ; f_hat] stacked on sublanes
    w1    : (2S, 2S)            block-diagonal
    wd    : (out_pad, 2S)       [-W2_f | W2_fhat], zero-padded rows
    b*    : (rows, 1)           broadcast along lanes
    out   : (1, block_m)        per-example squared prediction error
    """
    cdt = w0_ref.dtype                       # compute dtype (f32 or bf16)
    x = x_ref[...].astype(cdt)               # (bm, ob)

    # Layer 0: contract ob_dim of both operands -> (2S, bm); batch on lanes.
    z0 = jax.lax.dot_general(
        w0_ref[...], x, (((1,), (1,)), ((), ())),
        preferred_element_type=jnp.float32)
    h = jnp.tanh(z0.astype(cdt) + b0_ref[...])

    # Layer 1 (block-diagonal fused): (2S, 2S) @ (2S, bm) -> (2S, bm)
    z1 = jnp.dot(w1_ref[...], h, preferred_element_type=jnp.float32)
    h = jnp.tanh(z1.astype(cdt) + b1_ref[...])

    # Folded difference layer: d = f_hat(x) - f(x), padded rows are exact 0.
    d = jnp.dot(wd_ref[...], h, preferred_element_type=jnp.float32) + bd_ref[...]
    out_ref[...] = jnp.sum(d * d, axis=0, keepdims=True)


# ----------------------------------------------------------------------------
# Parameter packing (PyTorch nn.Linear orientation: weight = (out, in)).
# Call ONCE at init; do not re-pack per forward call.
# ----------------------------------------------------------------------------
def pack_params(f_params, fhat_params, *, compute_dtype=jnp.float32):
    fw0, fb0, fw1, fb1, fw2, fb2 = f_params
    gw0, gb0, gw1, gb1, gw2, gb2 = fhat_params
    size = fw0.shape[0]
    output_size = fw2.shape[0]
    out_pad = int(_round_up(output_size, 8))

    W0 = jnp.concatenate([fw0, gw0], axis=0).astype(compute_dtype)        # (2S, ob)
    B0 = jnp.concatenate([fb0, gb0], axis=0).reshape(2 * size, 1).astype(compute_dtype)

    z = jnp.zeros((size, size), jnp.float32)
    W1 = jnp.block([[fw1, z], [z, gw1]]).astype(compute_dtype)            # (2S, 2S)
    B1 = jnp.concatenate([fb1, gb1], axis=0).reshape(2 * size, 1).astype(compute_dtype)

    # Folded difference: d = [-W2_f | W2_fhat] @ [h_f ; h_fhat] + (b2_fhat - b2_f)
    Wd_rows = jnp.concatenate([-fw2, gw2], axis=1)                        # (out, 2S)
    Wd = (jnp.zeros((out_pad, 2 * size), jnp.float32)
          .at[:output_size].set(Wd_rows).astype(compute_dtype))           # (out_pad, 2S)
    Bd = (jnp.zeros((out_pad,), jnp.float32)
          .at[:output_size].set(gb2 - fb2).reshape(out_pad, 1))           # f32 bias

    return W0, B0, W1, B1, Wd, Bd


def _resident_spec(shape):
    # Whole-array block, constant index map -> stays resident in VMEM.
    return pl.BlockSpec(shape, lambda i: (0, 0))


# ----------------------------------------------------------------------------
# Wrapper
# ----------------------------------------------------------------------------
def rnd_forward(ob_no, packed_params, *, block_m=1024):
    """ob_no: (N, ob_dim) float32. Returns (N, 1) prediction error (float32)."""
    n, ob_dim = ob_no.shape
    W0, B0, W1, B1, Wd, Bd = packed_params
    two_s = W0.shape[0]
    out_pad = Wd.shape[0]

    # Lane-dense batch tile (multiple of 128); cap so grid >= 2 when the batch
    # allows it (v7x has 2 TensorCores; v5e/v6e unaffected by the extra tile).
    n_ceil = int(_round_up(n, 128))
    bm = min(int(block_m), n_ceil)
    if n_ceil >= 256:
        bm = min(bm, int(_round_up(pl.cdiv(n_ceil, 2), 128)))
    bm = max(bm, 128)
    n_pad = int(_round_up(n, bm))
    grid = n_pad // bm

    # Only a cheap batch-axis zero-pad (no transpose copy); padded rows produce
    # junk lanes that are sliced off below.
    x = ob_no if n_pad == n else jnp.pad(ob_no, ((0, n_pad - n), (0, 0)))

    x_spec = pl.BlockSpec((bm, ob_dim), lambda i: (i, 0))
    param_specs = [_resident_spec(p.shape) for p in packed_params]
    out_spec = pl.BlockSpec((1, bm), lambda i: (0, i))

    flops = 2 * n_pad * (two_s * ob_dim + two_s * two_s + out_pad * two_s)
    param_bytes = sum(math.prod(p.shape) * p.dtype.itemsize for p in packed_params)
    cost = pl.CostEstimate(
        flops=int(flops),
        transcendentals=int(2 * two_s * n_pad),
        bytes_accessed=int(n_pad * ob_dim * ob_no.dtype.itemsize
                           + param_bytes + n_pad * 4),
    )

    out = pl.pallas_call(
        rnd_kernel,
        out_shape=jax.ShapeDtypeStruct((1, n_pad), jnp.float32),
        grid=(grid,),
        in_specs=[x_spec] + param_specs,
        out_specs=out_spec,
        compiler_params=pltpu.CompilerParams(
            dimension_semantics=("parallel",)),
        cost_estimate=cost,
    )(x, *packed_params)

    return out[0, :n][:, None]                                  # (N, 1)


# ----------------------------------------------------------------------------
# Deterministic parameters + pure-JAX reference
# ----------------------------------------------------------------------------
def make_params(key, ob_dim, size, output_size):
    """Weights in PyTorch nn.Linear orientation (out_features, in_features)."""
    keys = jax.random.split(key, 12)
    # f: uniform[0,1) weights & biases  (init_method_1)
    f_params = (
        jax.random.uniform(keys[0], (size, ob_dim), jnp.float32),
        jax.random.uniform(keys[1], (size,), jnp.float32),
        jax.random.uniform(keys[2], (size, size), jnp.float32),
        jax.random.uniform(keys[3], (size,), jnp.float32),
        jax.random.uniform(keys[4], (output_size, size), jnp.float32),
        jax.random.uniform(keys[5], (output_size,), jnp.float32),
    )
    # f_hat: standard normal weights & biases  (init_method_2)
    fhat_params = (
        jax.random.normal(keys[6], (size, ob_dim), jnp.float32),
        jax.random.normal(keys[7], (size,), jnp.float32),
        jax.random.normal(keys[8], (size, size), jnp.float32),
        jax.random.normal(keys[9], (size,), jnp.float32),
        jax.random.normal(keys[10], (output_size, size), jnp.float32),
        jax.random.normal(keys[11], (output_size,), jnp.float32),
    )
    return f_params, fhat_params


def _mlp_ref(x, w0, b0, w1, b1, w2, b2):
    h = jnp.tanh(x @ w0.T + b0)
    h = jnp.tanh(h @ w1.T + b1)
    return h @ w2.T + b2


def rnd_reference(ob_no, f_params, fhat_params):
    f_out = _mlp_ref(ob_no, *f_params)
    g_out = _mlp_ref(ob_no, *fhat_params)
    return jnp.sum((g_out - f_out) ** 2, axis=1, keepdims=True)


# ----------------------------------------------------------------------------
if __name__ == "__main__":
    # hparams: ob_dim=16, rnd_size=32, rnd_n_layers=2, rnd_output_size=5
    ob_dim, size, output_size = 16, 32, 5
    batch = 8

    key = jax.random.PRNGKey(0)
    k_x, k_p = jax.random.split(key)
    ob_no = jax.random.normal(k_x, (batch, ob_dim), jnp.float32)
    f_params, fhat_params = make_params(k_p, ob_dim, size, output_size)

    ref = rnd_reference(ob_no, f_params, fhat_params)

    # Pack once at init (hoisted out of the per-call path), jit the forward.
    packed_f32 = pack_params(f_params, fhat_params)
    fwd = jax.jit(functools.partial(rnd_forward, block_m=1024))

    out = jax.block_until_ready(fwd(ob_no, packed_f32))
    assert out.shape == (batch, 1)
    assert jnp.allclose(out, ref, rtol=1e-4, atol=1e-4)

    # bf16 elementwise/activation path (recommended on v6e/v7x): looser check.
    packed_bf16 = pack_params(f_params, fhat_params, compute_dtype=jnp.bfloat16)
    out_bf16 = jax.block_until_ready(fwd(ob_no, packed_bf16))
    assert out_bf16.shape == (batch, 1)
    assert jnp.allclose(out_bf16, ref, rtol=5e-2, atol=5e-1)

    print("KERNEL_OK")
</pallas_src>

<mosaic_0001>
module attributes {stable_mosaic.version = 11 : i64} {
  func.func @rnd_kernel(%arg0: i32, %arg1: memref<128x16xf32, #tpu.memory_space<vmem>>, %arg2: memref<64x16xf32, #tpu.memory_space<vmem>>, %arg3: memref<64x1xf32, #tpu.memory_space<vmem>>, %arg4: memref<64x64xf32, #tpu.memory_space<vmem>>, %arg5: memref<64x1xf32, #tpu.memory_space<vmem>>, %arg6: memref<8x64xf32, #tpu.memory_space<vmem>>, %arg7: memref<8x1xf32, #tpu.memory_space<vmem>>, %arg8: memref<1x128xf32, #tpu.memory_space<vmem>>) attributes {dimension_semantics = [#tpu.dimension_semantics<parallel>], iteration_bounds = array<i64: 1>, scalar_prefetch = 0 : i64, scratch_operands = 0 : i64, tpu.core_type = #tpu.core_type<tc>, window_params = [{transform_indices = @transform_0, window_bounds = array<i64: 128, 16>}, {pipeline_mode = #tpu.pipeline_mode<synchronous>, transform_indices = @transform_1, window_bounds = array<i64: 64, 16>}, {pipeline_mode = #tpu.pipeline_mode<synchronous>, transform_indices = @transform_2, window_bounds = array<i64: 64, 1>}, {pipeline_mode = #tpu.pipeline_mode<synchronous>, transform_indices = @transform_3, window_bounds = array<i64: 64, 64>}, {pipeline_mode = #tpu.pipeline_mode<synchronous>, transform_indices = @transform_4, window_bounds = array<i64: 64, 1>}, {pipeline_mode = #tpu.pipeline_mode<synchronous>, transform_indices = @transform_5, window_bounds = array<i64: 8, 64>}, {pipeline_mode = #tpu.pipeline_mode<synchronous>, transform_indices = @transform_6, window_bounds = array<i64: 8, 1>}, {transform_indices = @transform_7, window_bounds = array<i64: 1, 128>}]} {
    %c0 = arith.constant 0 : index
    %c0_0 = arith.constant 0 : index
    %0 = vector.load %arg1[%c0, %c0_0] : memref<128x16xf32, #tpu.memory_space<vmem>>, vector<128x16xf32>
    %c0_1 = arith.constant 0 : index
    %c0_2 = arith.constant 0 : index
    %1 = vector.load %arg2[%c0_1, %c0_2] : memref<64x16xf32, #tpu.memory_space<vmem>>, vector<64x16xf32>
    %cst = arith.constant dense<0.000000e+00> : vector<64x128xf32>
    %2 = tpu.matmul %1, %0, %cst {dimension_numbers = #tpu.dot_dimension_numbers<[1], [1], [0], [0], [0, 0, 1, 0], [], []>} : vector<64x16xf32>, vector<128x16xf32>, vector<64x128xf32> -> vector<64x128xf32>
    %c0_3 = arith.constant 0 : index
    %c0_4 = arith.constant 0 : index
    %3 = vector.load %arg3[%c0_3, %c0_4] : memref<64x1xf32, #tpu.memory_space<vmem>>, vector<64x1xf32>
    %4 = vector.broadcast %3 : vector<64x1xf32> to vector<64x128xf32>
    %5 = arith.addf %2, %4 : vector<64x128xf32>
    %6 = math.tanh %5 : vector<64x128xf32>
    %c0_5 = arith.constant 0 : index
    %c0_6 = arith.constant 0 : index
    %7 = vector.load %arg4[%c0_5, %c0_6] : memref<64x64xf32, #tpu.memory_space<vmem>>, vector<64x64xf32>
    %cst_7 = arith.constant dense<0.000000e+00> : vector<64x128xf32>
    %8 = tpu.matmul %7, %6, %cst_7 {dimension_numbers = #tpu.dot_dimension_numbers<[1], [0], [0], [1], [0, 0, 1, 1], [], []>} : vector<64x64xf32>, vector<64x128xf32>, vector<64x128xf32> -> vector<64x128xf32>
    %c0_8 = arith.constant 0 : index
    %c0_9 = arith.constant 0 : index
    %9 = vector.load %arg5[%c0_8, %c0_9] : memref<64x1xf32, #tpu.memory_space<vmem>>, vector<64x1xf32>
    %10 = vector.broadcast %9 : vector<64x1xf32> to vector<64x128xf32>
    %11 = arith.addf %8, %10 : vector<64x128xf32>
    %12 = math.tanh %11 : vector<64x128xf32>
    %c0_10 = arith.constant 0 : index
    %c0_11 = arith.constant 0 : index
    %13 = vector.load %arg6[%c0_10, %c0_11] : memref<8x64xf32, #tpu.memory_space<vmem>>, vector<8x64xf32>
    %cst_12 = arith.constant dense<0.000000e+00> : vector<8x128xf32>
    %14 = tpu.matmul %13, %12, %cst_12 {dimension_numbers = #tpu.dot_dimension_numbers<[1], [0], [0], [1], [0, 0, 1, 1], [], []>} : vector<8x64xf32>, vector<64x128xf32>, vector<8x128xf32> -> vector<8x128xf32>
    %c0_13 = arith.constant 0 : index
    %c0_14 = arith.constant 0 : index
    %15 = vector.load %arg7[%c0_13, %c0_14] : memref<8x1xf32, #tpu.memory_space<vmem>>, vector<8x1xf32>
    %16 = vector.broadcast %15 : vector<8x1xf32> to vector<8x128xf32>
    %17 = arith.addf %14, %16 : vector<8x128xf32>
    %18 = arith.mulf %17, %17 : vector<8x128xf32>
    %cst_15 = arith.constant dense<0.000000e+00> : vector<128xf32>
    %19 = vector.multi_reduction <add>, %18, %cst_15 [0] : vector<8x128xf32> to vector<128xf32>
    %20 = vector.shape_cast %19 : vector<128xf32> to vector<1x128xf32>
    %c0_16 = arith.constant 0 : index
    %c0_17 = arith.constant 0 : index
    %21 = vector.load %arg8[%c0_16, %c0_17] : memref<1x128xf32, #tpu.memory_space<vmem>>, vector<1x128xf32>
    tpu.vector_store %arg8[%c0_16, %c0_17], %20 {strides = array<i32>} : memref<1x128xf32, #tpu.memory_space<vmem>>, vector<1x128xf32>,
    return
  }
  func.func @transform_0(%arg0: i32) -> (i32, i32) {
    %c0_i32 = arith.constant 0 : i32
    %c0_i32_0 = arith.constant 0 : i32
    return %arg0, %c0_i32 : i32, i32
  }
  func.func @transform_1(%arg0: i32) -> (i32, i32) {
    %c0_i32 = arith.constant 0 : i32
    %c0_i32_0 = arith.constant 0 : i32
    %c0_i32_1 = arith.constant 0 : i32
    return %c0_i32, %c0_i32_0 : i32, i32
  }
  func.func @transform_2(%arg0: i32) -> (i32, i32) {
    %c0_i32 = arith.constant 0 : i32
    %c0_i32_0 = arith.constant 0 : i32
    %c0_i32_1 = arith.constant 0 : i32
    return %c0_i32, %c0_i32_0 : i32, i32
  }
  func.func @transform_3(%arg0: i32) -> (i32, i32) {
    %c0_i32 = arith.constant 0 : i32
    %c0_i32_0 = arith.constant 0 : i32
    %c0_i32_1 = arith.constant 0 : i32
    return %c0_i32, %c0_i32_0 : i32, i32
  }
  func.func @transform_4(%arg0: i32) -> (i32, i32) {
    %c0_i32 = arith.constant 0 : i32
    %c0_i32_0 = arith.constant 0 : i32
    %c0_i32_1 = arith.constant 0 : i32
    return %c0_i32, %c0_i32_0 : i32, i32
  }
  func.func @transform_5(%arg0: i32) -> (i32, i32) {
    %c0_i32 = arith.constant 0 : i32
    %c0_i32_0 = arith.constant 0 : i32
    %c0_i32_1 = arith.constant 0 : i32
    return %c0_i32, %c0_i32_0 : i32, i32
  }
  func.func @transform_6(%arg0: i32) -> (i32, i32) {
    %c0_i32 = arith.constant 0 : i32
    %c0_i32_0 = arith.constant 0 : i32
    %c0_i32_1 = arith.constant 0 : i32
    return %c0_i32, %c0_i32_0 : i32, i32
  }
  func.func @transform_7(%arg0: i32) -> (i32, i32) {
    %c0_i32 = arith.constant 0 : i32
    %c0_i32_0 = arith.constant 0 : i32
    return %c0_i32, %arg0 : i32, i32
  }
}

</mosaic_0001>

<bundles_post_ra>
// kernel: rnd_forward.1
= control target key start
LH: loop header
LB: loop body
LE: loop exit
PB: predicated region body
PF: predicated region fallthrough
CT: control target
= control target key end

     0   :  { %vm98_vm0 = vcmask 130048   ;;  %v780_v2 = vmov 0   ;;  %vm340_vm1 = vcmask 523264   ;;  %vm782_vm2 = vmmov 0   ;;  %s1025_s0 = inlined_call_operand.vmem [shape: f32[128,16], index: 0, kind: input, shape index: {}]   ;;  %s1026_s1 = inlined_call_operand.vmem [shape: f32[64,16], index: 1, kind: input, shape index: {}]   ;;  %s1027_s2 = inlined_call_operand.vmem [shape: f32[64,1], index: 2, kind: input, shape index: {}]   ;;  %s1028_s4 = inlined_call_operand.vmem [shape: f32[64,1], index: 4, kind: input, shape index: {}]   ;;  %s1029_s6 = inlined_call_operand.vmem [shape: f32[8,1], index: 6, kind: input, shape index: {}]   ;;  %s1030_s3 = inlined_call_operand.vmem [shape: f32[64,64], index: 3, kind: input, shape index: {}]   ;;  %s1031_s5 = inlined_call_operand.vmem [shape: f32[8,64], index: 5, kind: input, shape index: {}]   ;;  %s1032_s7 = inlined_call_operand.vmem [shape: f32[1,128], index: 7, kind: output, shape index: {}]  }
   0x1   :  { %v41_v0 = vld [vmem:[%s1025_s0 + $0x78] sm:$0xff]  ;;  %v40_v1 = vld [vmem:[%s1025_s0 + $0x70] sm:$0xff]  ;;  %746 = vset.pattern.permute.xlu0 %v780_v2  ;;  %747 = vset.pattern.permute.xlu1 %v780_v2  ;;  %v39_v3 = vld [vmem:[%s1025_s0 + $0x68] sm:$0xff] }
   0x2   :  { %652 = vmatprep.subr.msk.mxu0 %vm98_vm0, %v41_v0  ;;  %v42_v4 = vld [vmem:[%s1026_s1] sm:$0xff]  ;;  %v57_v6 = vld [vmem:[%s1027_s2 + $0x38] sm:$0xff]  ;;  %v55_v7 = vld [vmem:[%s1027_s2 + $0x28] sm:$0xff] }
   0x3   :  { %653 = vmatpush3.xpose.msk.msra.mxu0 %vm98_vm0, %v41_v0  ;;  %684 = vmatprep.mubr.msk.f32.mxu0 %vm98_vm0, %v42_v4  ;;  %v38_v5 = vld [vmem:[%s1025_s0 + $0x60] sm:$0xff]  ;;  %v56_v8 = vld [vmem:[%s1027_s2 + $0x30] sm:$0xff]  ;;  %v37_v10 = vld [vmem:[%s1025_s0 + $0x58] sm:$0xff] }
   0x4   :  { %654 = vmatprep.subr.msk.mxu0 %vm98_vm0, %v40_v1  ;;  %95 = vperm.xlu0 %746, %v57_v6   ;;  %v54_v9 = vld [vmem:[%s1027_s2 + $0x20] sm:$0xff]  ;;  %v53_v11 = vld [vmem:[%s1027_s2 + $0x18] sm:$0xff]  ;;  %v52_v12 = vld [vmem:[%s1027_s2 + $0x10] sm:$0xff] }
   0x5   :  { %85 = vperm.xlu1 %747, %v55_v7   ;;  %v36_v13 = vld [vmem:[%s1025_s0 + $0x50] sm:$0xff]  ;;  %v51_v14 = vld [vmem:[%s1027_s2 + $0x8] sm:$0xff]  ;;  %v50_v15 = vld [vmem:[%s1027_s2] sm:$0xff] }
   0x6   :  { %v35_v16 = vld [vmem:[%s1025_s0 + $0x48] sm:$0xff]  ;;  %v299_v17 = vld [vmem:[%s1028_s4 + $0x38] sm:$0xff]  ;;  %v298_v18 = vld [vmem:[%s1028_s4 + $0x30] sm:$0xff] }
   0x7   :  { %655 = vmatpush3.xpose.msk.msra.mxu0 %vm98_vm0, %v40_v1  ;;  %v34_v19 = vld [vmem:[%s1025_s0 + $0x40] sm:$0xff]  ;;  %v297_v20 = vld [vmem:[%s1028_s4 + $0x28] sm:$0xff]  ;;  %v33_v22 = vld [vmem:[%s1025_s0 + $0x38] sm:$0xff] }
   0x8   :  { %656 = vmatprep.subr.msk.mxu0 %vm98_vm0, %v39_v3  ;;  %90 = vperm.xlu0 %746, %v56_v8   ;;  %v296_v21 = vld [vmem:[%s1028_s4 + $0x20] sm:$0xff]  ;;  %v295_v23 = vld [vmem:[%s1028_s4 + $0x18] sm:$0xff]  ;;  %v294_v24 = vld [vmem:[%s1028_s4 + $0x10] sm:$0xff] }
   0x9   :  { %80 = vperm.xlu1 %747, %v54_v9   ;;  %v32_v25 = vld [vmem:[%s1025_s0 + $0x30] sm:$0xff]  ;;  %v293_v26 = vld [vmem:[%s1028_s4 + $0x8] sm:$0xff]  ;;  %v292_v27 = vld [vmem:[%s1028_s4] sm:$0xff] }
   0xa   :  { %v31_v28 = vld [vmem:[%s1025_s0 + $0x28] sm:$0xff]  ;;  %v479_v29 = vld [vmem:[%s1029_s6] sm:$0xff]  ;;  %v29_v31 = vld [vmem:[%s1025_s0 + $0x18] sm:$0xff] }
   0xb   :  { %657 = vmatpush3.xpose.msk.msra.mxu0 %vm98_vm0, %v39_v3  ;;  %v30_v30 = vld [vmem:[%s1025_s0 + $0x20] sm:$0xff]  ;;  %v28_v32 = vld [vmem:[%s1025_s0 + $0x10] sm:$0xff]  ;;  %v27_v33 = vld [vmem:[%s1025_s0 + $0x8] sm:$0xff] }
   0xc   :  { %658 = vmatprep.subr.msk.mxu0 %vm98_vm0, %v38_v5  ;;  %75 = vperm.xlu0 %746, %v53_v11   ;;  %v26_v34 = vld [vmem:[%s1025_s0] sm:$0xff]  ;;  %v43_v35 = vld [vmem:[%s1026_s1 + $0x8] sm:$0xff]  ;;  %v44_v36 = vld [vmem:[%s1026_s1 + $0x10] sm:$0xff] }
   0xd   :  { %70 = vperm.xlu1 %747, %v52_v12   ;;  %v45_v37 = vld [vmem:[%s1026_s1 + $0x18] sm:$0xff]  ;;  %v46_v38 = vld [vmem:[%s1026_s1 + $0x20] sm:$0xff]  ;;  %v47_v39 = vld [vmem:[%s1026_s1 + $0x28] sm:$0xff] }
   0xe   :  { %v48_v40 = vld [vmem:[%s1026_s1 + $0x30] sm:$0xff]  ;;  %v49_v41 = vld [vmem:[%s1026_s1 + $0x38] sm:$0xff]  ;;  %v284_v42 = vld [vmem:[%s1030_s3] sm:$0xff] }
   0xf   :  { %659 = vmatpush3.xpose.msk.msra.mxu0 %vm98_vm0, %v38_v5  ;;  %712 = vmatprep.mubr.msk.f32.mxu1 %vm340_vm1, %v284_v42  ;;  %v285_v11 = vld [vmem:[%s1030_s3 + $0x8] sm:$0xff]  ;;  %v286_v12 = vld [vmem:[%s1030_s3 + $0x10] sm:$0xff] }
  0x10   :  { %660 = vmatprep.subr.msk.mxu0 %vm98_vm0, %v37_v10  ;;  %65 = vperm.xlu0 %746, %v51_v14   ;;  %v288_v14 = vld [vmem:[%s1030_s3 + $0x20] sm:$0xff] }
  0x11   :  { %60 = vperm.xlu1 %747, %v50_v15   ;;  %v289_v15 = vld [vmem:[%s1030_s3 + $0x28] sm:$0xff] }
  0x13   :  { %661 = vmatpush3.xpose.msk.msra.mxu0 %vm98_vm0, %v37_v10 }
  0x14   :  { %662 = vmatprep.subr.msk.mxu0 %vm98_vm0, %v36_v13  ;;  %337 = vperm.xlu0 %746, %v299_v17   ;;  %v291_v17 = vld [vmem:[%s1030_s3 + $0x38] sm:$0xff] }
  0x15   :  { %332 = vperm.xlu1 %747, %v298_v18   ;;  %v781_v18 = vmov 0.0  }
  0x17   :  { %663 = vmatpush3.xpose.msk.msra.mxu0 %vm98_vm0, %v36_v13  ;;  %v287_v13 = vld [vmem:[%s1030_s3 + $0x18] sm:$0xff] }
  0x18   :  { %664 = vmatprep.subr.msk.mxu0 %vm98_vm0, %v35_v16  ;;  %327 = vperm.xlu0 %746, %v297_v20  }
  0x19   :  { %322 = vperm.xlu1 %747, %v296_v21  }
  0x1b   :  { %665 = vmatpush3.xpose.msk.msra.mxu0 %vm98_vm0, %v35_v16  ;;  %v290_v16 = vld [vmem:[%s1030_s3 + $0x30] sm:$0xff] }
  0x1c   :  { %666 = vmatprep.subr.msk.mxu0 %vm98_vm0, %v34_v19  ;;  %317 = vperm.xlu0 %746, %v295_v23  }
  0x1d   :  { %312 = vperm.xlu1 %747, %v294_v24  }
  0x1f   :  { %667 = vmatpush3.xpose.msk.msra.mxu0 %vm98_vm0, %v34_v19 }
  0x20   :  { %668 = vmatprep.subr.msk.mxu0 %vm98_vm0, %v33_v22  ;;  %307 = vperm.xlu0 %746, %v293_v26  }
  0x21   :  { %302 = vperm.xlu1 %747, %v292_v27  }
  0x23   :  { %669 = vmatpush3.xpose.msk.msra.mxu0 %vm98_vm0, %v33_v22 }
  0x24   :  { %670 = vmatprep.subr.msk.mxu0 %vm98_vm0, %v32_v25  ;;  %482 = vperm.xlu0 %746, %v479_v29  }
  0x27   :  { %671 = vmatpush3.xpose.msk.msra.mxu0 %vm98_vm0, %v32_v25 }
  0x28   :  { %672 = vmatprep.subr.msk.mxu0 %vm98_vm0, %v31_v28 }
  0x2b   :  { %673 = vmatpush3.xpose.msk.msra.mxu0 %vm98_vm0, %v31_v28 }
  0x2c   :  { %674 = vmatprep.subr.msk.mxu0 %vm98_vm0, %v30_v30 }
  0x2f   :  { %675 = vmatpush3.xpose.msk.msra.mxu0 %vm98_vm0, %v30_v30 }
  0x30   :  { %676 = vmatprep.subr.msk.mxu0 %vm98_vm0, %v29_v31 }
  0x33   :  { %677 = vmatpush3.xpose.msk.msra.mxu0 %vm98_vm0, %v29_v31 }
  0x34   :  { %678 = vmatprep.subr.msk.mxu0 %vm98_vm0, %v28_v32 }
  0x37   :  { %679 = vmatpush3.xpose.msk.msra.mxu0 %vm98_vm0, %v28_v32 }
  0x38   :  { %680 = vmatprep.subr.msk.mxu0 %vm98_vm0, %v27_v33 }
  0x3b   :  { %681 = vmatpush3.xpose.msk.msra.mxu0 %vm98_vm0, %v27_v33 }
  0x3c   :  { %682 = vmatprep.subr.msk.mxu0 %vm98_vm0, %v26_v34 }
  0x3f   :  { %683 = vmatpush3.xpose.msk.msra.mxu0 %vm98_vm0, %v26_v34 }
  0x42   :  { %685 = vmatmul.mubr.msk.f32.vlgmr.msra.gmra.mxu0 %vm98_vm0, %v43_v35 }
  0x43   :  { %687 = vmatprep.mubr.msk.f32.mxu0 %vm98_vm0, %v44_v36 }
  0x46   :  { %688 = vmatmul.mubr.msk.f32.gmra.mxu0 %vm98_vm0, %v45_v37 }
  0x47   :  { %690 = vmatprep.mubr.msk.f32.mxu0 %vm98_vm0, %v46_v38 }
  0x4a   :  { %691 = vmatmul.mubr.msk.f32.gmra.mxu0 %vm98_vm0, %v47_v39 }
  0x4b   :  { %693 = vmatprep.mubr.msk.f32.mxu0 %vm98_vm0, %v48_v40 }
  0x4e   :  { %694 = vmatmul.mubr.msk.f32.gmra.mxu0 %vm98_vm0, %v49_v41 }
  0x7f   :  { %v96_v45 = vpop.permute.xlu0 %95 }
  0x80   :  { %v86_v47 = vpop.permute.xlu1 %85 }
  0x83   :  { %v91_v50 = vpop.permute.xlu0 %90 }
  0x84   :  { %v81_v52 = vpop.permute.xlu1 %80 }
  0x87   :  { %v76_v58 = vpop.permute.xlu0 %75 }
  0x88   :  { %v71_v60 = vpop.permute.xlu1 %70 }
  0x8b   :  { %v66_v63 = vpop.permute.xlu0 %65 }
  0x8c   :  { %v61_v1 = vpop.permute.xlu1 %60 }
  0x8f   :  { %v338_v21 = vpop.permute.xlu0 %337 }
  0x90   :  { %v333_v23 = vpop.permute.xlu1 %332 }
  0x93   :  { %v328_v26 = vpop.permute.xlu0 %327 }
  0x94   :  { %v323_v28 = vpop.permute.xlu1 %322 }
  0x97   :  { %v318_v34 = vpop.permute.xlu0 %317 }
  0x98   :  { %v313_v36 = vpop.permute.xlu1 %312 }
  0x9b   :  { %v308_v39 = vpop.permute.xlu0 %307 }
  0x9c   :  { %v303_v41 = vpop.permute.xlu1 %302 }
 0x102   :  { %v686_v43 = vpop.f32.mrf.mxu0 }
 0x103   :  { %v243_v0 = vadd.f32 %v686_v43, %v66_v63 }
 0x104   :  { %v237_v44 = vpop.f32.mrf.mxu0 }
 0x105   :  { %v238_v2 = vadd.f32 %v237_v44, %v61_v1 }
 0x106   :  { %v689_v46 = vpop.f32.mrf.mxu0 }
 0x107   :  { %v253_v61 = vadd.f32 %v689_v46, %v76_v58 }
 0x108   :  { %v247_v48 = vpop.f32.mrf.mxu0 }
 0x109   :  { %v248_v62 = vadd.f32 %v247_v48, %v71_v60 }
 0x10a   :  { %v692_v49 = vpop.f32.mrf.mxu0 }
 0x10b   :  { %v263_v56 = vadd.f32 %v692_v49, %v86_v47 }
 0x10c   :  { %v257_v51 = vpop.f32.mrf.mxu0 }
 0x10d   :  { %v258_v59 = vadd.f32 %v257_v51, %v81_v52  ;;  %v483_v52 = vpop.permute.xlu0 %482 }
 0x10e   :  { %v695_v53 = vpop.f32.mrf.mxu0 }
 0x10f   :  { %v273_v54 = vadd.f32 %v695_v53, %v96_v45 }
 0x110   :  { %v267_v55 = vpop.f32.mrf.mxu0 }
 0x111   :  { %748 = vtanh.f32 %v273_v54  ;;  %v268_v57 = vadd.f32 %v267_v55, %v91_v50  ;;  %v478_v50 = vld [vmem:[%s1031_s5] sm:$0xff] }
 0x113   :  { %750 = vtanh.f32 %v268_v57 }
 0x114   :  { %752 = vtanh.f32 %v263_v56 }
 0x115   :  { %754 = vtanh.f32 %v258_v59 }
 0x116   :  { %756 = vtanh.f32 %v253_v61 }
 0x117   :  { %758 = vtanh.f32 %v248_v62 }
 0x118   :  { %760 = vtanh.f32 %v243_v0 }
 0x119   :  { %762 = vtanh.f32 %v238_v2 }
 0x11e   :  { %v749_v3 = vpop.eup %748 }
 0x11f   :  { %696 = vmatprep.subr.mxu1 %v749_v3 }
 0x120   :  { %v751_v4 = vpop.eup %750  ;;  %697 = vmatpush3.msra.mxu1 %v749_v3 }
 0x121   :  { %698 = vmatprep.subr.mxu1 %v751_v4  ;;  %v753_v5 = vpop.eup %752 }
 0x122   :  { %699 = vmatpush3.msra.mxu1 %v751_v4  ;;  %v755_v6 = vpop.eup %754 }
 0x123   :  { %700 = vmatprep.subr.mxu1 %v753_v5  ;;  %v757_v7 = vpop.eup %756 }
 0x124   :  { %701 = vmatpush3.msra.mxu1 %v753_v5  ;;  %v759_v8 = vpop.eup %758 }
 0x125   :  { %702 = vmatprep.subr.mxu1 %v755_v6  ;;  %v761_v9 = vpop.eup %760 }
 0x126   :  { %703 = vmatpush3.msra.mxu1 %v755_v6  ;;  %v763_v10 = vpop.eup %762 }
 0x127   :  { %704 = vmatprep.subr.mxu1 %v757_v7 }
 0x128   :  { %705 = vmatpush3.msra.mxu1 %v757_v7 }
 0x129   :  { %706 = vmatprep.subr.mxu1 %v759_v8 }
 0x12a   :  { %707 = vmatpush3.msra.mxu1 %v759_v8 }
 0x12b   :  { %708 = vmatprep.subr.mxu1 %v761_v9 }
 0x12c   :  { %709 = vmatpush3.msra.mxu1 %v761_v9 }
 0x12d   :  { %710 = vmatprep.subr.mxu1 %v763_v10 }
 0x12e   :  { %711 = vmatpush3.msra.mxu1 %v763_v10 }
 0x12f   :  { %713 = vmatmul.mubr.msk.f32.vlgmr.msra.gmra.mxu1 %vm340_vm1, %v285_v11  ;;  %724 = vmatprep.subr.mxu1 %v781_v18 }
 0x130   :  { %715 = vmatprep.mubr.msk.f32.mxu1 %vm340_vm1, %v286_v12 }
 0x133   :  { %716 = vmatmul.mubr.msk.f32.gmra.mxu1 %vm340_vm1, %v287_v13 }
 0x134   :  { %718 = vmatprep.mubr.msk.f32.mxu1 %vm340_vm1, %v288_v14 }
 0x137   :  { %719 = vmatmul.mubr.msk.f32.gmra.mxu1 %vm340_vm1, %v289_v15 }
 0x138   :  { %721 = vmatprep.mubr.msk.f32.mxu1 %vm340_vm1, %v290_v16 }
 0x13b   :  { %722 = vmatmul.mubr.msk.f32.gmra.mxu1 %vm340_vm1, %v291_v17 }
 0x13c   :  { %740 = vmatprep.mubr.msk.f32.mxu1 %vm782_vm2, %v781_v18 }
 0x1ef   :  { %v714_v19 = vpop.f32.mrf.mxu1 }
 0x1f0   :  { %v437_v40 = vadd.f32 %v714_v19, %v308_v39 }
 0x1f1   :  { %v431_v20 = vpop.f32.mrf.mxu1 }
 0x1f2   :  { %v432_v42 = vadd.f32 %v431_v20, %v303_v41 }
 0x1f3   :  { %v717_v22 = vpop.f32.mrf.mxu1 }
 0x1f4   :  { %v447_v37 = vadd.f32 %v717_v22, %v318_v34 }
 0x1f5   :  { %v441_v24 = vpop.f32.mrf.mxu1 }
 0x1f6   :  { %v442_v38 = vadd.f32 %v441_v24, %v313_v36 }
 0x1f7   :  { %v720_v25 = vpop.f32.mrf.mxu1 }
 0x1f8   :  { %v457_v32 = vadd.f32 %v720_v25, %v328_v26 }
 0x1f9   :  { %v451_v27 = vpop.f32.mrf.mxu1 }
 0x1fa   :  { %v452_v35 = vadd.f32 %v451_v27, %v323_v28 }
 0x1fb   :  { %v723_v29 = vpop.f32.mrf.mxu1 }
 0x1fc   :  { %v467_v30 = vadd.f32 %v723_v29, %v338_v21 }
 0x1fd   :  { %v461_v31 = vpop.f32.mrf.mxu1 }
 0x1fe   :  { %764 = vtanh.f32 %v467_v30  ;;  %v462_v33 = vadd.f32 %v461_v31, %v333_v23 }
 0x200   :  { %766 = vtanh.f32 %v462_v33 }
 0x201   :  { %768 = vtanh.f32 %v457_v32 }
 0x202   :  { %770 = vtanh.f32 %v452_v35 }
 0x203   :  { %772 = vtanh.f32 %v447_v37 }
 0x204   :  { %774 = vtanh.f32 %v442_v38 }
 0x205   :  { %776 = vtanh.f32 %v437_v40 }
 0x206   :  { %778 = vtanh.f32 %v432_v42 }
 0x20b   :  { %v765_v43 = vpop.eup %764 }
 0x20c   :  { %725 = vmatpush3.msra.mxu1 %v765_v43 }
 0x20d   :  { %v767_v44 = vpop.eup %766  ;;  %726 = vmatprep.subr.mxu1 %v781_v18 }
 0x20e   :  { %727 = vmatpush3.msra.mxu1 %v767_v44  ;;  %v769_v45 = vpop.eup %768 }
 0x20f   :  { %728 = vmatprep.subr.mxu1 %v781_v18  ;;  %v771_v46 = vpop.eup %770 }
 0x210   :  { %729 = vmatpush3.msra.mxu1 %v769_v45  ;;  %v773_v47 = vpop.eup %772 }
 0x211   :  { %730 = vmatprep.subr.mxu1 %v781_v18  ;;  %v775_v48 = vpop.eup %774 }
 0x212   :  { %731 = vmatpush3.msra.mxu1 %v771_v46  ;;  %v777_v49 = vpop.eup %776 }
 0x213   :  { %732 = vmatprep.subr.mxu1 %v781_v18  ;;  %v779_v51 = vpop.eup %778 }
 0x214   :  { %733 = vmatpush3.msra.mxu1 %v773_v47 }
 0x215   :  { %734 = vmatprep.subr.mxu1 %v781_v18 }
 0x216   :  { %735 = vmatpush3.msra.mxu1 %v775_v48 }
 0x217   :  { %736 = vmatprep.subr.mxu1 %v781_v18 }
 0x218   :  { %737 = vmatpush3.msra.mxu1 %v777_v49 }
 0x219   :  { %738 = vmatprep.subr.mxu1 %v781_v18 }
 0x21a   :  { %739 = vmatpush3.msra.mxu1 %v779_v51 }
 0x21b   :  { %741 = vmatmul.mubr.msk.f32.vlgmr.msra.gmra.mxu1 %vm340_vm1, %v478_v50 }
 0x2db   :  { %v554_v53 = vpop.f32.mrf.mxu1 }
 0x2dc   :  { %v555_v54 = vadd.f32 %v554_v53, %v483_v52 }
 0x2dd   :  { %v742_v55 = vpop.f32.mrf.mxu1 }
 0x2de   :  { %v558_v56 = vmul.f32 %v555_v54, %v555_v54 }
 0x2e0   :  { %v559_v57 = vrot.slane %v558_v56, 4 }
 0x2e2   :  { %v560_v58 = vadd.f32 %v559_v57, %v558_v56 }
 0x2e4   :  { %v561_v59 = vrot.slane %v560_v58, 2 }
 0x2e6   :  { %v562_v60 = vadd.f32 %v561_v59, %v560_v58 }
 0x2e8   :  { %v563_v61 = vrot.slane %v562_v60, 1 }
 0x2ea   :  { %v564_v62 = vadd.f32 %v563_v61, %v562_v60 }
 0x2ec   :  { %565 = vst [vmem:[%s1032_s7] sm:$0x1] %v564_v62 }

</bundles_post_ra>
